<compile_context>
chip_gen: v7x
topology: tpu7x:2x2x1
jax: 0.10.0
libtpu: 0.0.40
codegen_flags: <defaults>
</compile_context>

<pallas_src>
import functools

import jax
import jax.numpy as jnp
from jax.experimental import pallas as pl
from jax.experimental.pallas import tpu as pltpu

LANES = 128
# (4096, 128) f32 block = 2 MiB per input per buffer; 3 inputs x 2 buffers = 12 MiB,
# safe on every generation (v7x: 64 MiB physical / TC) while minimizing per-step overhead.
MAX_ROW_TILE = 4096
# Explicit scoped-VMEM limit: larger than the 12 MiB (+output+scratch) we actually use,
# well under v7x's 64 MiB physical, and overrides v5e's 16 MiB scoped default.
_VMEM_LIMIT_BYTES = 32 << 20


def _partial_bce_kernel(*refs, has_weights, rows, row_tile, needs_mask, out_sublanes):
    if has_weights:
        x_ref, t_ref, w_ref, o_ref = refs
    else:
        x_ref, t_ref, o_ref = refs
        w_ref = None

    x = x_ref[...].astype(jnp.float32)
    t = t_ref[...].astype(jnp.float32)

    # torch.nn.functional.binary_cross_entropy clamps the log terms at -100.
    # Keep the clamp BEFORE the multiply so t==0 exactly cancels the term (no 0*(-inf)).
    log_x = jnp.maximum(jnp.log(x), jnp.float32(-100.0))
    log_1mx = jnp.maximum(jnp.log(1.0 - x), jnp.float32(-100.0))
    per_elem = -(t * log_x + (1.0 - t) * log_1mx)
    if has_weights:
        per_elem = per_elem * w_ref[...].astype(jnp.float32)

    if needs_mask:
        # Last grid block over-covers the row range; the out-of-range VMEM rows are
        # unspecified, so zero their contribution (select drops any NaN/Inf there).
        i = pl.program_id(0)
        row_idx = jax.lax.broadcasted_iota(jnp.int32, per_elem.shape, 0) + i * row_tile
        per_elem = jnp.where(row_idx < rows, per_elem, jnp.float32(0.0))

    if out_sublanes == 8:
        # (row_tile, 128) -> (row_tile//8, 8, 128) splits only the sublane-major axis
        # along native (8, 128) tile boundaries; the reduce stays on the VPU and the
        # writeback is a full, unmasked (8, 128) store.
        per_elem = per_elem.reshape(row_tile // 8, 8, LANES)
        o_ref[...] = jnp.sum(per_elem, axis=0)
    else:
        o_ref[...] = jnp.sum(per_elem, axis=0, keepdims=True)


def _bce_sum_plain(x, t, w=None):
    """Plain-JAX clamped-weighted-BCE sum (used for the <128-element ragged tail)."""
    x = x.astype(jnp.float32)
    t = t.astype(jnp.float32)
    log_x = jnp.maximum(jnp.log(x), jnp.float32(-100.0))
    log_1mx = jnp.maximum(jnp.log(1.0 - x), jnp.float32(-100.0))
    per = -(t * log_x + (1.0 - t) * log_1mx)
    if w is not None:
        per = per * w.astype(jnp.float32)
    return jnp.sum(per, dtype=jnp.float32)


def focal_loss(inputs, targets, weights=None, *, focusing_param=2.0, balance_param=0.25):
    """Pallas TPU implementation of FocalLoss.forward. Returns a scalar (f32).

    `inputs` must be probabilities in (0, 1). `targets` / `weights` may be any real
    dtype (e.g. bf16 / int8 targets); they are cast to f32 in-kernel, so narrower
    dtypes directly reduce HBM traffic on this memory-bound kernel.
    """
    n = inputs.size
    has_weights = weights is not None
    if has_weights and weights.shape != inputs.shape:
        # TODO(synk): route small (e.g. per-class) weights through SMEM scalar-prefetch
        # instead of materializing the broadcast (extra n-sized HBM write + read).
        weights = jnp.broadcast_to(weights, inputs.shape)

    flat = [inputs.reshape(-1), targets.reshape(-1)]
    if has_weights:
        flat.append(weights.reshape(-1))

    rows = n // LANES
    tail = n - rows * LANES

    # Ragged tail (< 128 elements): handled with plain JAX, so the kernel inputs never
    # need a full-array pad copy.
    tail_sum = jnp.float32(0.0)
    if tail:
        tail_ops = [a[rows * LANES:] for a in flat]
        tail_sum = _bce_sum_plain(*tail_ops)

    if rows == 0:
        total = tail_sum
    else:
        if tail:
            ops = [a[: rows * LANES].reshape(rows, LANES) for a in flat]
        else:
            ops = [a.reshape(rows, LANES) for a in flat]  # free reshape, no copy

        if rows <= MAX_ROW_TILE:
            row_tile = rows          # single block == full array dims -> legal for any dtype
        else:
            row_tile = MAX_ROW_TILE  # multiple of 32 -> legal tiling for f32/bf16/int8
        grid = pl.cdiv(rows, row_tile)
        needs_mask = (rows % row_tile) != 0
        out_sublanes = 8 if (row_tile % 8) == 0 else 1

        kernel = functools.partial(
            _partial_bce_kernel,
            has_weights=has_weights,
            rows=rows,
            row_tile=row_tile,
            needs_mask=needs_mask,
            out_sublanes=out_sublanes,
        )

        n_k = rows * LANES
        out_bytes = grid * out_sublanes * LANES * 4
        cost = pl.CostEstimate(
            flops=8 * n_k,
            transcendentals=2 * n_k,
            bytes_accessed=int(sum(int(a.size) * a.dtype.itemsize for a in ops) + out_bytes),
        )

        in_spec = pl.BlockSpec((row_tile, LANES), lambda i: (i, 0))
        partials = pl.pallas_call(
            kernel,
            out_shape=jax.ShapeDtypeStruct((grid * out_sublanes, LANES), jnp.float32),
            grid=(grid,),
            in_specs=[in_spec] * len(ops),
            out_specs=pl.BlockSpec((out_sublanes, LANES), lambda i: (i, 0)),
            compiler_params=pltpu.CompilerParams(
                # Each grid step owns its output tile -> fully independent steps.
                dimension_semantics=("parallel",),
                vmem_limit_bytes=_VMEM_LIMIT_BYTES,
            ),
            cost_estimate=cost,
        )(*ops)
        total = jnp.sum(partials, dtype=jnp.float32) + tail_sum

    # Tiny scalar epilogue: mean -> focal transform (runs once; negligible cost).
    bce = total / jnp.float32(n)                 # reduction='mean'
    logpt = -bce
    pt = jnp.exp(logpt)
    one_minus_pt = 1.0 - pt
    gamma = float(focusing_param)
    if gamma == 2.0:
        modulator = one_minus_pt * one_minus_pt  # avoid pow -> exp/log round-trip
    else:
        modulator = one_minus_pt ** jnp.float32(gamma)
    focal = -modulator * logpt
    return jnp.float32(balance_param) * focal


def _focal_loss_ref(inputs, targets, weights=None, focusing_param=2.0, balance_param=0.25):
    if weights is None:
        weights = jnp.ones_like(inputs)
    log_x = jnp.maximum(jnp.log(inputs), -100.0)
    log_1mx = jnp.maximum(jnp.log(1.0 - inputs), -100.0)
    bce = jnp.mean(-weights * (targets * log_x + (1.0 - targets) * log_1mx))
    logpt = -bce
    pt = jnp.exp(logpt)
    return balance_param * (-((1.0 - pt) ** focusing_param) * logpt)


if __name__ == "__main__":
    key = jax.random.PRNGKey(0)
    k1, k2, k3 = jax.random.split(key, 3)

    B, C, H, W = 2, 4, 16, 16
    # inputs are probabilities in (0, 1) (as required by binary_cross_entropy)
    inputs = jax.nn.sigmoid(jax.random.normal(k1, (B, C, H, W), jnp.float32))
    targets = jax.random.bernoulli(k2, 0.5, (B, C, H, W)).astype(jnp.float32)
    weights = jax.random.uniform(k3, (B, C, H, W), jnp.float32, 0.5, 1.5)

    out_w = focal_loss(inputs, targets, weights)        # weighted path (3-input kernel)
    out_nw = focal_loss(inputs, targets)                # weights=None specialized path
    jax.block_until_ready((out_w, out_nw))

    assert jnp.allclose(out_w, _focal_loss_ref(inputs, targets, weights), rtol=1e-5, atol=1e-6)
    assert jnp.allclose(out_nw, _focal_loss_ref(inputs, targets), rtol=1e-5, atol=1e-6)

    # Ragged n (n % 128 != 0): kernel handles the multiple-of-128 prefix, wrapper sums the
    # <128-element tail -- no full-array pad copy.
    kr1, kr2, kr3 = jax.random.split(jax.random.PRNGKey(1), 3)
    shape_r = (2, 4, 13, 13)
    xr = jax.nn.sigmoid(jax.random.normal(kr1, shape_r, jnp.float32))
    tr = jax.random.bernoulli(kr2, 0.5, shape_r).astype(jnp.float32)
    wr = jax.random.uniform(kr3, shape_r, jnp.float32, 0.5, 1.5)
    out_r = focal_loss(xr, tr, wr)
    assert jnp.allclose(out_r, _focal_loss_ref(xr, tr, wr), rtol=1e-5, atol=1e-6)

    # Multi-block grid + in-kernel partial-block row mask + narrow (bf16) targets dtype.
    km1, km2 = jax.random.split(jax.random.PRNGKey(2), 2)
    shape_m = (2, 4, 256, 257)                          # rows = 4112 > MAX_ROW_TILE
    xm = jax.nn.sigmoid(jax.random.normal(km1, shape_m, jnp.float32))
    tm = jax.random.bernoulli(km2, 0.5, shape_m).astype(jnp.bfloat16)
    out_m = focal_loss(xm, tm)
    ref_m = _focal_loss_ref(xm, tm.astype(jnp.float32))
    assert jnp.allclose(out_m, ref_m, rtol=1e-4, atol=1e-5)

    jax.block_until_ready((out_r, out_m))
    print("KERNEL_OK")
</pallas_src>

<mosaic_0001>
module attributes {stable_mosaic.version = 11 : i64} {
  func.func @_partial_bce_kernel(%arg0: i32, %arg1: memref<16x128xf32, #tpu.memory_space<vmem>>, %arg2: memref<16x128xf32, #tpu.memory_space<vmem>>, %arg3: memref<16x128xf32, #tpu.memory_space<vmem>>, %arg4: memref<8x128xf32, #tpu.memory_space<vmem>>) attributes {dimension_semantics = [#tpu.dimension_semantics<parallel>], iteration_bounds = array<i64: 1>, scalar_prefetch = 0 : i64, scratch_operands = 0 : i64, tpu.core_type = #tpu.core_type<tc>, window_params = [{transform_indices = @transform_0, window_bounds = array<i64: 16, 128>}, {transform_indices = @transform_1, window_bounds = array<i64: 16, 128>}, {transform_indices = @transform_2, window_bounds = array<i64: 16, 128>}, {transform_indices = @transform_3, window_bounds = array<i64: 8, 128>}]} {
    %c0 = arith.constant 0 : index
    %c0_0 = arith.constant 0 : index
    %0 = vector.load %arg1[%c0, %c0_0] : memref<16x128xf32, #tpu.memory_space<vmem>>, vector<16x128xf32>
    %c0_1 = arith.constant 0 : index
    %c0_2 = arith.constant 0 : index
    %1 = vector.load %arg2[%c0_1, %c0_2] : memref<16x128xf32, #tpu.memory_space<vmem>>, vector<16x128xf32>
    %2 = math.log %0 : vector<16x128xf32>
    %cst = arith.constant -1.000000e+02 : f32
    %3 = vector.broadcast %cst : f32 to vector<16x128xf32>
    %4 = arith.maximumf %2, %3 : vector<16x128xf32>
    %cst_3 = arith.constant 1.000000e+00 : f32
    %5 = vector.broadcast %cst_3 : f32 to vector<16x128xf32>
    %6 = arith.subf %5, %0 : vector<16x128xf32>
    %7 = math.log %6 : vector<16x128xf32>
    %cst_4 = arith.constant -1.000000e+02 : f32
    %8 = vector.broadcast %cst_4 : f32 to vector<16x128xf32>
    %9 = arith.maximumf %7, %8 : vector<16x128xf32>
    %10 = arith.mulf %1, %4 : vector<16x128xf32>
    %cst_5 = arith.constant 1.000000e+00 : f32
    %11 = vector.broadcast %cst_5 : f32 to vector<16x128xf32>
    %12 = arith.subf %11, %1 : vector<16x128xf32>
    %13 = arith.mulf %12, %9 : vector<16x128xf32>
    %14 = arith.addf %10, %13 : vector<16x128xf32>
    %cst_6 = arith.constant 0.000000e+00 : f32
    %15 = vector.broadcast %cst_6 : f32 to vector<16x128xf32>
    %16 = arith.subf %15, %14 : vector<16x128xf32>
    %c0_7 = arith.constant 0 : index
    %c0_8 = arith.constant 0 : index
    %17 = vector.load %arg3[%c0_7, %c0_8] : memref<16x128xf32, #tpu.memory_space<vmem>>, vector<16x128xf32>
    %18 = arith.mulf %16, %17 : vector<16x128xf32>
    %19 = vector.shape_cast %18 : vector<16x128xf32> to vector<2x8x128xf32>
    %cst_9 = arith.constant dense<0.000000e+00> : vector<8x128xf32>
    %20 = vector.multi_reduction <add>, %19, %cst_9 [0] : vector<2x8x128xf32> to vector<8x128xf32>
    %c0_10 = arith.constant 0 : index
    %c0_11 = arith.constant 0 : index
    %21 = vector.load %arg4[%c0_10, %c0_11] : memref<8x128xf32, #tpu.memory_space<vmem>>, vector<8x128xf32>
    tpu.vector_store %arg4[%c0_10, %c0_11], %20 {strides = array<i32>} : memref<8x128xf32, #tpu.memory_space<vmem>>, vector<8x128xf32>,
    return
  }
  func.func @transform_0(%arg0: i32) -> (i32, i32) {
    %c0_i32 = arith.constant 0 : i32
    %c0_i32_0 = arith.constant 0 : i32
    return %arg0, %c0_i32 : i32, i32
  }
  func.func @transform_1(%arg0: i32) -> (i32, i32) {
    %c0_i32 = arith.constant 0 : i32
    %c0_i32_0 = arith.constant 0 : i32
    return %arg0, %c0_i32 : i32, i32
  }
  func.func @transform_2(%arg0: i32) -> (i32, i32) {
    %c0_i32 = arith.constant 0 : i32
    %c0_i32_0 = arith.constant 0 : i32
    return %arg0, %c0_i32 : i32, i32
  }
  func.func @transform_3(%arg0: i32) -> (i32, i32) {
    %c0_i32 = arith.constant 0 : i32
    %c0_i32_0 = arith.constant 0 : i32
    return %arg0, %c0_i32 : i32, i32
  }
}

</mosaic_0001>

<bundles_post_ra>
// kernel: tpu_custom_call.1
= control target key start
LH: loop header
LB: loop body
LE: loop exit
PB: predicated region body
PF: predicated region fallthrough
CT: control target
= control target key end

     0   :  { %8 = vsyncpa [#allocation3], 0  ;;  %s304_s0 = inlined_call_operand.hbm [shape: f32[16,128], index: 0, kind: input, shape index: {}]   ;;  %s305_s1 = inlined_call_operand.hbm [shape: f32[16,128], index: 1, kind: input, shape index: {}]   ;;  %s306_s2 = inlined_call_operand.hbm [shape: f32[16,128], index: 2, kind: input, shape index: {}]   ;;  %s307_s3 = inlined_call_operand.hbm [shape: f32[8,128], index: 3, kind: output, shape index: {}]  }
   0x1   :  { %9 = vsyncpa [#allocation6], 0 }
   0x2   :  { %10 = vsyncpa [#allocation4], 0  ;;  %s214_s12 = smov [#allocation5]   ;;  %s215_s14 = smov [#allocation2]  }
   0x3   :  { %s28_s13 = sshll.u32 %s214_s12, 4  ;;  %s16_s15 = sshll.u32 %s215_s14, 4  ;;  %s29_s13 = int_to_ptr.vmem [resolvable:$true] %s28_s13  ;;  %s240_s15 = int_to_ptr.vmem [resolvable:$true] %s16_s15 }
   0x4   :  { %s120_s18 = scalar_lea.hbm %s305_s1, 256 }
   0x5   :  { %p121_p0 = scmp.ne.s32.totalorder %s305_s1, %s120_s18  ;;  %p124_p1 = scmp.lt.u32.totalorder %s120_s18, %s305_s1 }
   0x7   :  { %p126_p2 = pnand %p124_p1, %p121_p0 }
   0x9   :  { %129 = shalt.err (!%p126_p2)
}
   0xa   :  { %s130_s23 = scalar_lea.vmem %s29_s13, 256  ;;  %p135_p4 = scmp.lt.s32.totalorder %s29_s13, %s29_s13 }
   0xb   :  { %p131_p3 = scmp.ne.s32.totalorder %s29_s13, %s130_s23  ;;  %p136_p5 = scmp.lt.s32.totalorder %s130_s23, %s130_s23 }
   0xd   :  { %p137_p6 = por %p136_p5, %p135_p4 }
   0xf   :  { %p138_p7 = pnand %p137_p6, %p131_p3 }
  0x11   :  { %141 = shalt.err (!%p138_p7)
}
  0x12   :  { %s216_s24 = smov 128   ;;  %s217_s25 = smov 8  }
  0x13   :  { %34 = dma.hbm_to_vmem [thread:$0]  %s305_s1, 256, %s29_s13, [#allocation6], %s216_s24, %s216_s24, %s217_s25  }
  0x14   :  { %s142_s30 = scalar_lea.hbm %s304_s0, 256 }
  0x15   :  { %p143_p8 = scmp.ne.s32.totalorder %s304_s0, %s142_s30  ;;  %p146_p9 = scmp.lt.u32.totalorder %s142_s30, %s304_s0 }
  0x17   :  { %p148_p10 = pnand %p146_p9, %p143_p8 }
  0x19   :  { %151 = shalt.err (!%p148_p10)
}
  0x1a   :  { %s152_s8 = scalar_lea.vmem %s240_s15, 256  ;;  %p157_p12 = scmp.lt.s32.totalorder %s240_s15, %s240_s15 }
  0x1b   :  { %p153_p11 = scmp.ne.s32.totalorder %s240_s15, %s152_s8  ;;  %p158_p13 = scmp.lt.s32.totalorder %s152_s8, %s152_s8 }
  0x1d   :  { %p159_p0 = por %p158_p13, %p157_p12 }
  0x1f   :  { %p160_p1 = pnand %p159_p0, %p153_p11 }
  0x21   :  { %163 = shalt.err (!%p160_p1)
}
  0x22   :  { %22 = dma.hbm_to_vmem [thread:$0]  %s304_s0, 256, %s240_s15, [#allocation3], %s216_s24, %s216_s24, %s217_s25  }
  0x23   :  { %s218_s10 = smov [#allocation7]   ;;  %s164_s14 = scalar_lea.hbm %s306_s2, 256 }
  0x24   :  { %s40_s11 = sshll.u32 %s218_s10, 4  ;;  %p165_p2 = scmp.ne.s32.totalorder %s306_s2, %s164_s14  ;;  %s41_s11 = int_to_ptr.vmem [resolvable:$true] %s40_s11 }
  0x25   :  { %p168_p3 = scmp.lt.u32.totalorder %s164_s14, %s306_s2 }
  0x27   :  { %p170_p4 = pnand %p168_p3, %p165_p2 }
  0x29   :  { %173 = shalt.err (!%p170_p4)
}
  0x2a   :  { %s174_s20 = scalar_lea.vmem %s41_s11, 256  ;;  %p179_p6 = scmp.lt.s32.totalorder %s41_s11, %s41_s11 }
  0x2b   :  { %p175_p5 = scmp.ne.s32.totalorder %s41_s11, %s174_s20  ;;  %p180_p7 = scmp.lt.s32.totalorder %s174_s20, %s174_s20 }
  0x2d   :  { %p181_p8 = por %p180_p7, %p179_p6 }
  0x2f   :  { %p182_p9 = pnand %p181_p8, %p175_p5 }
  0x31   :  { %185 = shalt.err (!%p182_p9)
}
  0x32   :  { %46 = dma.hbm_to_vmem [thread:$0]  %s306_s2, 256, %s41_s11, [#allocation6], %s216_s24, %s216_s24, %s217_s25  }
  0x33   :  { %208 = dma.done.wait [#allocation3], 256  }
  0x34   :  { %209 = vsyncadd [#allocation3], 4294967040 }
  0x35   :  { %210 = dma.done.wait [#allocation6], 512  }
  0x36   :  { %211 = vsyncadd [#allocation6], 4294966784  ;;  %v56_v0 = vld [vmem:[#allocation2] sm:$0xff]  ;;  %v57_v1 = vld [vmem:[#allocation2 + $0x8] sm:$0xff]  ;;  %s219_s2 = smov [#allocation8]  }
  0x37   :  { %112 = vlog2.f32 %v56_v0  ;;  %v66_v2 = vsub.f32 1.0, %v56_v0  ;;  %v67_v3 = vsub.f32 1.0, %v57_v1  ;;  %v58_v5 = vld [vmem:[#allocation5] sm:$0xff]  ;;  %v59_v7 = vld [vmem:[#allocation5 + $0x8] sm:$0xff]  ;;  %v84_v26 = vld [vmem:[#allocation7] sm:$0xff]  ;;  %s96_s21 = sshll.u32 %s219_s2, 4  ;;  %s97_s21 = int_to_ptr.vmem [resolvable:$true] %s96_s21 }
  0x38   :  { %114 = vlog2.f32 %v57_v1  ;;  %v76_v14 = vsub.f32 1.0, %v58_v5  ;;  %v77_v17 = vsub.f32 1.0, %v59_v7  ;;  %v85_v28 = vld [vmem:[#allocation7 + $0x8] sm:$0xff]  ;;  %s186_s22 = scalar_lea.vmem %s97_s21, 128  ;;  %p191_p11 = scmp.lt.s32.totalorder %s97_s21, %s97_s21 }
  0x39   :  { %116 = vlog2.f32 %v66_v2  ;;  %p187_p10 = scmp.ne.s32.totalorder %s97_s21, %s186_s22  ;;  %p192_p12 = scmp.lt.s32.totalorder %s186_s22, %s186_s22 }
  0x3a   :  { %118 = vlog2.f32 %v67_v3 }
  0x3b   :  { %p193_p13 = por %p192_p12, %p191_p11 }
  0x3d   :  { %p194_p0 = pnand %p193_p13, %p187_p10 }
  0x41   :  { %v113_v4 = vpop.eup %112 }
  0x42   :  { %v115_v6 = vpop.eup %114  ;;  %v61_v8 = vmul.f32 0.6931472, %v113_v4 }
  0x43   :  { %v117_v9 = vpop.eup %116  ;;  %v63_v10 = vmul.f32 0.6931472, %v115_v6 }
  0x44   :  { %v119_v11 = vpop.eup %118  ;;  %v64_v12 = vmax.f32 %v61_v8, -100.0  ;;  %v69_v13 = vmul.f32 0.6931472, %v117_v9 }
  0x45   :  { %v65_v15 = vmax.f32 %v63_v10, -100.0  ;;  %v71_v16 = vmul.f32 0.6931472, %v119_v11 }
  0x46   :  { %v72_v18 = vmax.f32 %v69_v13, -100.0  ;;  %v74_v19 = vmul.f32 %v64_v12, %v58_v5 }
  0x47   :  { %v73_v20 = vmax.f32 %v71_v16, -100.0  ;;  %v75_v21 = vmul.f32 %v65_v15, %v59_v7 }
  0x48   :  { %v78_v22 = vmul.f32 %v76_v14, %v72_v18 }
  0x49   :  { %v79_v23 = vmul.f32 %v77_v17, %v73_v20 }
  0x4a   :  { %v80_v24 = vadd.f32 %v78_v22, %v74_v19 }
  0x4b   :  { %v81_v25 = vadd.f32 %v79_v23, %v75_v21 }
  0x4c   :  { %v82_v27 = vsub.f32 0.0, %v80_v24 }
  0x4d   :  { %v83_v29 = vsub.f32 0.0, %v81_v25 }
  0x4e   :  { %v86_v30 = vmul.f32 %v84_v26, %v82_v27 }
  0x4f   :  { %v87_v31 = vmul.f32 %v85_v28, %v83_v29 }
  0x51   :  { %v88_v32 = vadd.f32 %v87_v31, %v86_v30 }
  0x53   :  { %89 = vst [vmem:[#allocation8] sm:$0xff] %v88_v32 }
  0x54   :  { %197 = shalt.err (!%p194_p0)
}
  0x55   :  { %s198_s25 = scalar_lea.hbm %s307_s3, 128 }
  0x56   :  { %p199_p1 = scmp.ne.s32.totalorder %s307_s3, %s198_s25  ;;  %p202_p2 = scmp.lt.u32.totalorder %s198_s25, %s307_s3 }
  0x58   :  { %p204_p3 = pnand %p202_p2, %p199_p1 }
  0x5a   :  { %207 = shalt.err (!%p204_p3)
}
  0x5b   :  { %99 = dma.vmem_to_hbm [thread:$0]  %s97_s21, 128, %s307_s3, [#allocation4]  }
  0x5c   :  { %212 = dma.done.wait [#allocation4], 128  }
  0x5d   :  { %213 = vsyncadd [#allocation4], 4294967168 }
  0x5e   :  { %103 = vsyncpa [#allocation3], 1 }
  0x5f   :  { %104 = vsyncpa [#allocation6], 1 }
  0x60   :  { %105 = vsyncpa [#allocation4], 1 }

</bundles_post_ra>
